<compile_context>
chip_gen: v6e
topology: v6e:2x2x1
jax: 0.10.0
libtpu: 0.0.40
codegen_flags: <defaults>
</compile_context>

<pallas_src>
import functools

import jax
import jax.numpy as jnp
from jax.experimental import pallas as pl
from jax.experimental.pallas import tpu as pltpu


def _round_up(n, m):
    return (n + m - 1) // m * m


def _cdiv(a, b):
    return (a + b - 1) // b


def _vmem_capacity_bytes():
    try:
        return int(pltpu.get_tpu_info().vmem_capacity_bytes)
    except Exception:
        return 64 * 2**20  # conservative fallback (v7x per-TC VMEM)


# --------------------------------------------------------------- main kernel
def _logits_lse_kernel(x_ref, wt_ref, b_ref, logits_ref, lse_ref, m_sc, l_sc,
                       *, vocab, tv):
    # x_ref      : (TM, D)   row tile, resident across the vocab axis
    # wt_ref     : (D, TV)   one vocab tile of the pre-transposed weight (streamed)
    # b_ref      : (NV, TV)  whole bias, resident (a single DMA for the grid)
    # logits_ref : (TM, TV)  streamed raw-logit output block
    # lse_ref    : (TM, 1)   per-row log-sum-exp, written on the last vocab tile
    # m_sc/l_sc  : (TM, 1)   f32 running max / running sum-exp
    k = pl.program_id(1)
    nv = pl.num_programs(1)

    @pl.when(k == 0)
    def _():
        m_sc[...] = jnp.full(m_sc.shape, -jnp.inf, dtype=m_sc.dtype)
        l_sc[...] = jnp.zeros(l_sc.shape, dtype=l_sc.dtype)

    # MXU matmul in native operand dtype; accumulate in f32.
    logits = jnp.dot(x_ref[...], wt_ref[...], preferred_element_type=jnp.float32)
    logits = logits + b_ref[k].astype(jnp.float32)

    # Ragged last vocab tile: columns >= vocab hold undefined weight data, mask
    # them so they never影响 the max / sum-exp (their output columns are
    # discarded by the bounded writeback anyway).
    if vocab % tv != 0:
        cols = k * tv + jax.lax.broadcasted_iota(jnp.int32, logits.shape, 1)
        logits = jnp.where(cols < vocab, logits, -1e30)

    # Stream raw logits straight out -- no full-vocab VMEM stash.
    logits_ref[...] = logits.astype(logits_ref.dtype)

    # Online (streaming) log-sum-exp across vocab tiles.
    m_prev = m_sc[...]
    m_new = jnp.maximum(m_prev, jnp.max(logits, axis=-1, keepdims=True))
    l_sc[...] = l_sc[...] * jnp.exp(m_prev - m_new) + jnp.sum(
        jnp.exp(logits - m_new), axis=-1, keepdims=True)
    m_sc[...] = m_new

    @pl.when(k == nv - 1)
    def _():
        lse_ref[...] = m_sc[...] + jnp.log(l_sc[...])


# ------------------------------------------------------- normalization pass
def _sub_lse_kernel(logits_ref, lse_ref, o_ref):
    o_ref[...] = (logits_ref[...].astype(jnp.float32)
                  - lse_ref[...]).astype(o_ref.dtype)


def generator_forward(x, weight_t, bias, *, tm=None, tv=None,
                      logits_stage_dtype=jnp.float32):
    """log_softmax(x @ weight_t + bias, axis=-1).

    x        : [batch, seq, d_model]
    weight_t : [d_model, vocab]   (nn.Linear weight, pre-transposed ONCE outside)
    bias     : [vocab]
    """
    batch, seq, d_model = x.shape
    assert weight_t.shape[0] == d_model
    vocab = weight_t.shape[1]
    assert bias.shape == (vocab,)
    rows = batch * seq
    out_dtype = x.dtype

    x_bytes = jnp.dtype(x.dtype).itemsize
    w_bytes = jnp.dtype(weight_t.dtype).itemsize
    stage_bytes = jnp.dtype(logits_stage_dtype).itemsize

    capacity = _vmem_capacity_bytes()
    budget = int(capacity * 0.85)          # leave headroom for Mosaic scratch

    # ---- vocab tile: lane-dense, prefer a multiple of 256 (MXU feed width).
    if tv is None:
        tv = min(512, _round_up(vocab, 256))
    tv = max(128, _round_up(tv, 128))
    # If the weight double-buffer alone would eat the budget, shrink tv, not tm.
    while tv > 256 and 2 * d_model * tv * w_bytes > budget // 3:
        tv = max(256, tv // 2)
    nv = _cdiv(vocab, tv)
    vocab_p = nv * tv

    # ---- row tile: big enough to amortize the weight stream, VMEM-bounded.
    fixed = (2 * d_model * tv * w_bytes      # weight tile double buffer
             + 2 * max(nv, 8) * tv * 4       # resident bias (sublane padded)
             + (4 << 20))                    # slack for internal scratch
    per_row = (2 * d_model * x_bytes         # x tile (double-buffered across i)
               + 2 * tv * stage_bytes        # streamed raw-logit block
               + 6 * 128 * 4)                # lse out + m/l scratch (lane padded)
    tm_cap = max(8, ((max(budget - fixed, 0) // per_row) // 8) * 8)
    if tm is None:
        tm = 768 if capacity >= (96 << 20) else 512   # v5e/v6e vs v7x defaults
    tm = _round_up(max(tm, 8), 8)
    tm = min(tm, _round_up(rows, 8), tm_cap)
    tm = max(8, tm)
    nr = _cdiv(rows, tm)

    # Only the tiny bias gets padded (to a whole number of vocab tiles); the
    # weight, activations and output stay unpadded in HBM.
    b2d = bias.reshape(1, vocab)
    if vocab_p != vocab:
        b2d = jnp.pad(b2d, ((0, 0), (0, vocab_p - vocab)))
    b2d = b2d.reshape(nv, tv)

    x2d = x.reshape(rows, d_model)

    vmem_bytes = (2 * tm * d_model * x_bytes
                  + 2 * d_model * tv * w_bytes
                  + 2 * max(nv, 8) * tv * 4
                  + 2 * tm * tv * stage_bytes
                  + 8 * tm * 128 * 4)
    vmem_cap = min(int(capacity * 0.9), capacity - (8 << 20))
    vmem_limit = int(min(max(int(vmem_bytes * 1.3) + (2 << 20), 16 << 20),
                         vmem_cap))

    kernel = functools.partial(_logits_lse_kernel, vocab=vocab, tv=tv)

    raw_logits, lse = pl.pallas_call(
        kernel,
        out_shape=(jax.ShapeDtypeStruct((rows, vocab), logits_stage_dtype),
                   jax.ShapeDtypeStruct((rows, 1), jnp.float32)),
        grid_spec=pltpu.PrefetchScalarGridSpec(
            num_scalar_prefetch=0,
            grid=(nr, nv),
            in_specs=[
                # x row tile: same block across the vocab axis -> resident.
                pl.BlockSpec((tm, d_model), lambda i, k: (i, 0)),
                # weight tile: streamed per vocab step (pipelined DMA).
                pl.BlockSpec((d_model, tv), lambda i, k: (0, k)),
                # whole bias: resident, one DMA for the entire grid.
                pl.BlockSpec((nv, tv), lambda i, k: (0, 0)),
            ],
            out_specs=[
                # raw logits: streamed lane-dense blocks, written every step.
                pl.BlockSpec((tm, tv), lambda i, k: (i, k)),
                # lse: resident across vocab axis, written on the last step.
                pl.BlockSpec((tm, 1), lambda i, k: (i, 0)),
            ],
            scratch_shapes=[
                pltpu.VMEM((tm, 1), jnp.float32),   # running max
                pltpu.VMEM((tm, 1), jnp.float32),   # running sum-exp
            ],
        ),
        compiler_params=pltpu.CompilerParams(
            dimension_semantics=("parallel", "arbitrary"),
            vmem_limit_bytes=vmem_limit,
        ),
    )(x2d, weight_t, b2d)

    # Cheap fused normalization pass: log_softmax = raw_logits - lse.
    tm2 = min(256, _round_up(rows, 8))
    tv2 = min(1024, _round_up(vocab, 128))
    out = pl.pallas_call(
        _sub_lse_kernel,
        out_shape=jax.ShapeDtypeStruct((rows, vocab), out_dtype),
        grid=(_cdiv(rows, tm2), _cdiv(vocab, tv2)),
        in_specs=[
            pl.BlockSpec((tm2, tv2), lambda i, j: (i, j)),
            pl.BlockSpec((tm2, 1), lambda i, j: (i, 0)),
        ],
        out_specs=pl.BlockSpec((tm2, tv2), lambda i, j: (i, j)),
        compiler_params=pltpu.CompilerParams(
            dimension_semantics=("parallel", "parallel")),
    )(raw_logits, lse)

    return out.reshape(batch, seq, vocab)


if __name__ == "__main__":
    # Small shapes consistent with the module; vocab=250 / seq=9 exercise the
    # ragged vocab tile and ragged row tile paths, tm=8 / tv=128 give a 3x2
    # grid so pipelining and the online LSE are active.
    batch, seq, d_model, vocab = 2, 9, 32, 250

    key = jax.random.PRNGKey(0)
    kx, kw, kb = jax.random.split(key, 3)

    x = jax.random.normal(kx, (batch, seq, d_model), dtype=jnp.float32)
    # nn.Linear(d_model, vocab) parameters in PyTorch layout.
    weight = jax.random.normal(kw, (vocab, d_model), dtype=jnp.float32) * 0.05
    bias = jax.random.normal(kb, (vocab,), dtype=jnp.float32) * 0.05

    # Hoist the transpose out of the per-call path: keep the projection weight
    # stored as [d_model, vocab] (done once, outside the kernel).
    weight_t = jnp.asarray(weight.T)

    ref = jax.nn.log_softmax(jnp.einsum("bsd,vd->bsv", x, weight) + bias, axis=-1)

    # Explicit small tiles (exercises multi-tile + ragged paths).
    out = generator_forward(x, weight_t, bias, tm=8, tv=128)
    out = jax.block_until_ready(out)
    assert out.shape == (batch, seq, vocab)
    assert jnp.allclose(out, ref, atol=1e-4, rtol=1e-4), float(
        jnp.max(jnp.abs(out - ref)))

    # Auto (generation-aware) tile selection path.
    out2 = jax.block_until_ready(generator_forward(x, weight_t, bias))
    assert jnp.allclose(out2, ref, atol=1e-4, rtol=1e-4), float(
        jnp.max(jnp.abs(out2 - ref)))

    print("KERNEL_OK")
</pallas_src>

<mosaic_0001>
module attributes {stable_mosaic.version = 11 : i64} {
  func.func @_logits_lse_kernel(%arg0: i32, %arg1: i32, %arg2: memref<8x32xf32, #tpu.memory_space<vmem>>, %arg3: memref<32x128xf32, #tpu.memory_space<vmem>>, %arg4: memref<2x128xf32, #tpu.memory_space<vmem>>, %arg5: memref<8x128xf32, #tpu.memory_space<vmem>>, %arg6: memref<8x1xf32, #tpu.memory_space<vmem>>, %arg7: memref<8x1xf32, #tpu.memory_space<vmem>>, %arg8: memref<8x1xf32, #tpu.memory_space<vmem>>) attributes {dimension_semantics = [#tpu.dimension_semantics<parallel>, #tpu.dimension_semantics<arbitrary>], iteration_bounds = array<i64: 3, 2>, scalar_prefetch = 0 : i64, scratch_operands = 2 : i64, tpu.core_type = #tpu.core_type<tc>, window_params = [{transform_indices = @transform_0, window_bounds = array<i64: 8, 32>}, {transform_indices = @transform_1, window_bounds = array<i64: 32, 128>}, {pipeline_mode = #tpu.pipeline_mode<synchronous>, transform_indices = @transform_2, window_bounds = array<i64: 2, 128>}, {transform_indices = @transform_3, window_bounds = array<i64: 8, 128>}, {transform_indices = @transform_4, window_bounds = array<i64: 8, 1>}]} {
    %c0_i32 = arith.constant 0 : i32
    %0 = arith.cmpi eq, %arg1, %c0_i32 : i32
    %1 = arith.extui %0 : i1 to i32
    %c0_i32_0 = arith.constant 0 : i32
    %2 = arith.cmpi ne, %1, %c0_i32_0 : i32
    scf.if %2 {
      %cst_19 = arith.constant 0xFF800000 : f32
      %40 = vector.broadcast %cst_19 : f32 to vector<8x1xf32>
      %c0_20 = arith.constant 0 : index
      %c0_21 = arith.constant 0 : index
      %41 = vector.load %arg7[%c0_20, %c0_21] : memref<8x1xf32, #tpu.memory_space<vmem>>, vector<8x1xf32>
      tpu.vector_store %arg7[%c0_20, %c0_21], %40 {strides = array<i32>} : memref<8x1xf32, #tpu.memory_space<vmem>>, vector<8x1xf32>,
      %cst_22 = arith.constant 0.000000e+00 : f32
      %42 = vector.broadcast %cst_22 : f32 to vector<8x1xf32>
      %c0_23 = arith.constant 0 : index
      %c0_24 = arith.constant 0 : index
      %43 = vector.load %arg8[%c0_23, %c0_24] : memref<8x1xf32, #tpu.memory_space<vmem>>, vector<8x1xf32>
      tpu.vector_store %arg8[%c0_23, %c0_24], %42 {strides = array<i32>} : memref<8x1xf32, #tpu.memory_space<vmem>>, vector<8x1xf32>,
    } else {
    }
    %c0 = arith.constant 0 : index
    %c0_1 = arith.constant 0 : index
    %3 = vector.load %arg2[%c0, %c0_1] : memref<8x32xf32, #tpu.memory_space<vmem>>, vector<8x32xf32>
    %c0_2 = arith.constant 0 : index
    %c0_3 = arith.constant 0 : index
    %4 = vector.load %arg3[%c0_2, %c0_3] : memref<32x128xf32, #tpu.memory_space<vmem>>, vector<32x128xf32>
    %cst = arith.constant dense<0.000000e+00> : vector<8x128xf32>
    %5 = tpu.matmul %3, %4, %cst {dimension_numbers = #tpu.dot_dimension_numbers<[1], [0], [0], [1], [0, 0, 1, 1], [], []>} : vector<8x32xf32>, vector<32x128xf32>, vector<8x128xf32> -> vector<8x128xf32>
    %6 = arith.index_cast %arg1 : i32 to index
    %c0_4 = arith.constant 0 : index
    %7 = vector.load %arg4[%6, %c0_4] : memref<2x128xf32, #tpu.memory_space<vmem>>, vector<1x128xf32>
    %8 = vector.shape_cast %7 : vector<1x128xf32> to vector<128xf32>
    %9 = vector.shape_cast %8 : vector<128xf32> to vector<1x128xf32>
    %10 = vector.broadcast %9 : vector<1x128xf32> to vector<8x128xf32>
    %11 = arith.addf %5, %10 : vector<8x128xf32>
    %c128_i32 = arith.constant 128 : i32
    %12 = arith.muli %arg1, %c128_i32 : i32
    %13 = tpu.iota {dimensions = array<i32: 1>} : vector<8x128xi32>
    %14 = vector.broadcast %12 : i32 to vector<8x128xi32>
    %15 = arith.addi %14, %13 : vector<8x128xi32>
    %c250_i32 = arith.constant 250 : i32
    %16 = vector.broadcast %c250_i32 : i32 to vector<8x128xi32>
    %17 = arith.cmpi slt, %15, %16 : vector<8x128xi32>
    %cst_5 = arith.constant -1.000000e+30 : f32
    %18 = vector.broadcast %cst_5 : f32 to vector<8x128xf32>
    %19 = arith.select %17, %11, %18 : vector<8x128xi1>, vector<8x128xf32>
    %c0_6 = arith.constant 0 : index
    %c0_7 = arith.constant 0 : index
    %20 = vector.load %arg5[%c0_6, %c0_7] : memref<8x128xf32, #tpu.memory_space<vmem>>, vector<8x128xf32>
    tpu.vector_store %arg5[%c0_6, %c0_7], %19 {strides = array<i32>} : memref<8x128xf32, #tpu.memory_space<vmem>>, vector<8x128xf32>,
    %c0_8 = arith.constant 0 : index
    %c0_9 = arith.constant 0 : index
    %21 = vector.load %arg7[%c0_8, %c0_9] : memref<8x1xf32, #tpu.memory_space<vmem>>, vector<8x1xf32>
    %cst_10 = arith.constant dense<0xFF800000> : vector<8xf32>
    %22 = vector.multi_reduction <maximumf>, %19, %cst_10 [1] : vector<8x128xf32> to vector<8xf32>
    %23 = vector.shape_cast %22 : vector<8xf32> to vector<8x1xf32>
    %24 = arith.maximumf %21, %23 : vector<8x1xf32>
    %c0_11 = arith.constant 0 : index
    %c0_12 = arith.constant 0 : index
    %25 = vector.load %arg8[%c0_11, %c0_12] : memref<8x1xf32, #tpu.memory_space<vmem>>, vector<8x1xf32>
    %26 = arith.subf %21, %24 : vector<8x1xf32>
    %27 = math.exp %26 : vector<8x1xf32>
    %28 = arith.mulf %25, %27 : vector<8x1xf32>
    %29 = vector.broadcast %24 : vector<8x1xf32> to vector<8x128xf32>
    %30 = arith.subf %19, %29 : vector<8x128xf32>
    %31 = math.exp %30 : vector<8x128xf32>
    %cst_13 = arith.constant dense<0.000000e+00> : vector<8xf32>
    %32 = vector.multi_reduction <add>, %31, %cst_13 [1] : vector<8x128xf32> to vector<8xf32>
    %33 = vector.shape_cast %32 : vector<8xf32> to vector<8x1xf32>
    %34 = arith.addf %28, %33 : vector<8x1xf32>
    %c0_14 = arith.constant 0 : index
    %c0_15 = arith.constant 0 : index
    %35 = vector.load %arg8[%c0_14, %c0_15] : memref<8x1xf32, #tpu.memory_space<vmem>>, vector<8x1xf32>
    tpu.vector_store %arg8[%c0_14, %c0_15], %34 {strides = array<i32>} : memref<8x1xf32, #tpu.memory_space<vmem>>, vector<8x1xf32>,
    %c0_16 = arith.constant 0 : index
    %c0_17 = arith.constant 0 : index
    %36 = vector.load %arg7[%c0_16, %c0_17] : memref<8x1xf32, #tpu.memory_space<vmem>>, vector<8x1xf32>
    tpu.vector_store %arg7[%c0_16, %c0_17], %24 {strides = array<i32>} : memref<8x1xf32, #tpu.memory_space<vmem>>, vector<8x1xf32>,
    %c1_i32 = arith.constant 1 : i32
    %37 = arith.cmpi eq, %arg1, %c1_i32 : i32
    %38 = arith.extui %37 : i1 to i32
    %c0_i32_18 = arith.constant 0 : i32
    %39 = arith.cmpi ne, %38, %c0_i32_18 : i32
    scf.if %39 {
      %c0_19 = arith.constant 0 : index
      %c0_20 = arith.constant 0 : index
      %40 = vector.load %arg7[%c0_19, %c0_20] : memref<8x1xf32, #tpu.memory_space<vmem>>, vector<8x1xf32>
      %c0_21 = arith.constant 0 : index
      %c0_22 = arith.constant 0 : index
      %41 = vector.load %arg8[%c0_21, %c0_22] : memref<8x1xf32, #tpu.memory_space<vmem>>, vector<8x1xf32>
      %42 = math.log %41 : vector<8x1xf32>
      %43 = arith.addf %40, %42 : vector<8x1xf32>
      %c0_23 = arith.constant 0 : index
      %c0_24 = arith.constant 0 : index
      %44 = vector.load %arg6[%c0_23, %c0_24] : memref<8x1xf32, #tpu.memory_space<vmem>>, vector<8x1xf32>
      tpu.vector_store %arg6[%c0_23, %c0_24], %43 {strides = array<i32>} : memref<8x1xf32, #tpu.memory_space<vmem>>, vector<8x1xf32>,
    } else {
    }
    return
  }
  func.func @transform_0(%arg0: i32, %arg1: i32) -> (i32, i32) {
    %c0_i32 = arith.constant 0 : i32
    %c0_i32_0 = arith.constant 0 : i32
    return %arg0, %c0_i32 : i32, i32
  }
  func.func @transform_1(%arg0: i32, %arg1: i32) -> (i32, i32) {
    %c0_i32 = arith.constant 0 : i32
    %c0_i32_0 = arith.constant 0 : i32
    return %c0_i32, %arg1 : i32, i32
  }
  func.func @transform_2(%arg0: i32, %arg1: i32) -> (i32, i32) {
    %c0_i32 = arith.constant 0 : i32
    %c0_i32_0 = arith.constant 0 : i32
    %c0_i32_1 = arith.constant 0 : i32
    return %c0_i32, %c0_i32_0 : i32, i32
  }
  func.func @transform_3(%arg0: i32, %arg1: i32) -> (i32, i32) {
    %c0_i32 = arith.constant 0 : i32
    return %arg0, %arg1 : i32, i32
  }
  func.func @transform_4(%arg0: i32, %arg1: i32) -> (i32, i32) {
    %c0_i32 = arith.constant 0 : i32
    %c0_i32_0 = arith.constant 0 : i32
    return %arg0, %c0_i32 : i32, i32
  }
}

</mosaic_0001>

<bundles_post_ra>
// kernel: tpu_custom_call.1
= control target key start
LH: loop header
LB: loop body
LE: loop exit
PB: predicated region body
PF: predicated region fallthrough
CT: control target
= control target key end

     0   :  { %s1295_s0 = inlined_call_operand.hbm [shape: f32[18,32], index: 0, kind: input, shape index: {}]   ;;  %s1296_s1 = inlined_call_operand.hbm [shape: f32[32,250], index: 1, kind: input, shape index: {}]   ;;  %s1297_s2 = inlined_call_operand.vmem [shape: f32[2,128], index: 2, kind: input, shape index: {}]   ;;  %s1298_s3 = inlined_call_operand.hbm [shape: f32[18,250], index: 3, kind: output, shape index: {0}]   ;;  %s1299_s4 = inlined_call_operand.vmem [shape: f32[18,1], index: 4, kind: output, shape index: {1}]  }
   0x1   :  { %1309 = sst [smem:[#allocation22_spill]] %s1295_s0 }
   0x2   :  { %10 = vsyncpa [#allocation5], 0 }
   0x3   :  { %12 = vsyncpa [#allocation5 + $0x1], 0 }
   0x4   :  { %13 = vsyncpa [#allocation8], 0 }
   0x5   :  { %15 = vsyncpa [#allocation8 + $0x1], 0 }
   0x6   :  { %16 = vsyncpa [#allocation6], 0 }
   0x7   :  { %18 = vsyncpa [#allocation6 + $0x1], 0  ;;  %s991_s15 = smov 0   ;;  %s993_s16 = smov 0  }
   0x8   :  { %s995_s17 = smov 0   ;;  %s997_s18 = smov 0  }
   0x9   :  { %s999_s19 = smov 0   ;;  %s1001_s20 = smov 0  }
   0xa   :  { %s1003_s21 = smov 0   ;;  %s1005_s22 = smov 0  }
   0xb   :  { %s1007_s23 = smov 0   ;;  %s1009_s24 = smov 0  }
   0xc   :  { %s1011_s25 = smov 0   ;;  %s1013_s26 = smov 0  }
   0xd   :  { %s1015_s27 = smov 0   ;;  %s1017_s28 = smov 0  }
   0xe LB: > { %1310 = sst [smem:[#allocation13_spill]] %s901_s15  ;;  %s1300_s29 = sadd.s32 4294967295, %s953_s28   ;;  %s953_s28 = sphi %s1017_s28, %s24_s28   ;;  %s949_s27 = sphi %s1015_s27, %s1344_s27   ;;  %s945_s26 = sphi %s1013_s26, %s1354_s26   ;;  %s941_s25 = sphi %s1011_s25, %s1342_s25   ;;  %s937_s24 = sphi %s1009_s24, %s1353_s24   ;;  %s933_s23 = sphi %s1007_s23, %s1341_s23   ;;  %s929_s22 = sphi %s1005_s22, %s1352_s22   ;;  %s925_s21 = sphi %s1003_s21, %s1351_s21   ;;  %s921_s20 = sphi %s1001_s20, %s1350_s20   ;;  %s917_s19 = sphi %s999_s19, %s1349_s19   ;;  %s913_s18 = sphi %s997_s18, %s1348_s18   ;;  %s909_s17 = sphi %s995_s17, %s1338_s17   ;;  %s905_s16 = sphi %s993_s16, %s1347_s16   ;;  %s901_s15 = sphi %s991_s15, %s1346_s15  }
   0xf   : > { %1311 = sst [smem:[#allocation14_spill]] %s909_s17  ;;  %s33_s5 = sadd.s32 1, %s945_s26 }
  0x10   : > { %1312 = sst [smem:[#allocation15_spill]] %s933_s23  ;;  %s36_s6 = sadd.s32 1, %s949_s27 }
  0x11   : > { %1313 = sst [smem:[#allocation16_spill]] %s949_s27  ;;  %p34_p0 = scmp.ge.s32.totalorder %s33_s5, 2 }
  0x12   : > { %s43_s7 = sadd.s32 1, %s933_s23  ;;  %p50_p1 = scmp.ne.s32.totalorder %s933_s23, %s929_s22 }
  0x13   : > { %p51_p2 = scmp.eq.s32.totalorder %s953_s28, 0  ;;  %s1356_s5 = smov (%p34_p0, %s33_s5), 0 }
  0x14   : > { %1314 = sst [smem:[#allocation17_spill]] %s1356_s5  ;;  %s1358_s6 = smov (!%p34_p0, %s36_s6), %s949_s27 }
  0x15   : > { %p1072_p3 = por %p51_p2, %p50_p1  ;;  %p56_p4 = scmp.ne.s32.totalorder %s929_s22, %s925_s21 }
  0x16   : > { %p38_p5 = scmp.ge.s32.totalorder %s1358_s6, 3  ;;  %p1079_p6 = scmp.eq.s32.totalorder %s1300_s29, 0 }
  0x17   : > { %s66_s10 = ssub.s32 %s945_s26, %s1356_s5  ;;  %s69_s11 = sadd.s32 1, %s921_s20 }
  0x18   : > { %s1360_s6 = smov (%p38_p5, %s1358_s6), 0  ;;  %p1090_p7 = por %p1079_p6, %p56_p4 }
  0x19   : > { %1317 = sst [smem:[#allocation18_spill]] %s1360_s6  ;;  %p67_p8 = scmp.eq.s32.totalorder %s66_s10, 0 }
  0x1a   : > { %s40_s13 = ssub.s32 %s949_s27, %s1360_s6  ;;  %p76_p9 = scmp.ne.s32.totalorder %s921_s20, %s917_s19 }
  0x1b   : > { %p41_p10 = scmp.eq.s32.totalorder %s40_s13, 0  ;;  %p82_p11 = scmp.ne.s32.totalorder %s917_s19, %s913_s18 }
  0x1c   : > { %s1101_s14 = scalar_select %p67_p8, %s921_s20, %s69_s11  }
  0x1d   : > { %s1104_s21 = scalar_select %p41_p10, %s933_s23, %s43_s7  }
  0x1e   : > { %1319 = sst [smem:[#allocation19_spill]] %s1101_s14  ;;  %p1108_p12 = por %p76_p9, %p51_p2 }
  0x1f   : > { %1320 = sst [smem:[#allocation20_spill]] %s1104_s21  ;;  %p1114_p13 = por %p82_p11, %p1079_p6 }
  0x20   : > { %s115_s6 = sor.u32 %s66_s10, %s40_s13  ;;  %s118_s5 = sadd.s32 1, %s909_s17 }
  0x21   : > { %s1322_s29 = scalar_select %p1114_p13, 1, 0 }
  0x22   : > { %p116_p0 = scmp.eq.s32.totalorder %s115_s6, 0  ;;  %p128_p1 = scmp.ne.s32.totalorder %s909_s17, %s905_s16 }
  0x23   : > { %s1323_s18 = sadd.s32 4294967295, %s953_s28   ;;  %p134_p5 = scmp.ne.s32.totalorder %s905_s16, %s901_s15 }
  0x24   : > { %p129_p4 = scmp.eq.s32.totalorder %s1323_s18, 5  ;;  %s1326_s9 = sadd.s32 4294967294, %s953_s28  }
  0x25   : > { %s1126_s7 = scalar_select %p116_p0, %s909_s17, %s118_s5  }
  0x26   : > { %p1128_p2 = por %p129_p4, %p128_p1  ;;  %p135_p6 = scmp.eq.s32.totalorder %s1326_s9, 5 }
  0x27   : > { %1324 = sst [smem:[#allocation21_spill]] %s1126_s7  ;;  %p620_p8 = scmp.lt.s32.totalorder %s953_s28, 6 }
  0x28   : > { %s1325_s11 = scalar_select %p1128_p2, 1, 0 }
  0x29   : > { %p1135_p9 = por %p135_p6, %p134_p5  ;;  %s184_s6 = sand.u32 1, %s933_s23  }
  0x2a   : > { %s568_s13 = sshll.u32 %s184_s6, 3  ;;  %s569_s21 = sshll.u32 %s949_s27, 7 }
  0x2b   : > { %s1327_s10 = scalar_select %p1135_p9, 1, 0 }
  0x2c   : > { %s1328_s0 = sld [smem:[#allocation22_spill]]  ;;  %s188_s5 = scalar_lea.vmem [#allocation4], %s568_s13 }
  0x2d   : > { %s195_s7 = sshll.u32 %s188_s5, 4  ;;  %p1146_p10 = pnand %p620_p8, %p1072_p3  ;;  %s196_s7 = int_to_ptr.vmem [resolvable:$true] %s195_s7 }
  0x2e   : > { %p1152_p11 = pnand %p620_p8, %p1108_p12  ;;  %p572_p0 = scmp.ge.s32.totalorder %s953_s28, 1 }
  0x2f   : > { %p220_p1 = scmp.lt.s32.totalorder %s953_s28, 7  ;;  %s185_s27 = scalar_lea.sflag [#allocation5], %s184_s6 }
  0x30   : > { %p751_p4 = pneg %p1146_p10  ;;  %s762_s14 = scalar_lea.vmem %s196_s7, 128 }
  0x31   : > { %p763_p5 = scmp.ne.s32.totalorder %s196_s7, %s762_s14  ;;  %s955_s8 = smov [#allocation4]  }
  0x32   : > { %s193_s15 = scalar_lea.hbm %s1328_s0, %s569_s21  ;;  %s767_s21 = sshll.u32 %s955_s8, 4  ;;  %s768_s21 = int_to_ptr.vmem [resolvable:$false] %s767_s21 }
  0x33   : > { %p765_p6 = pnand %p763_p5, %p751_p4  ;;  %s769_s13 = scalar_lea.vmem %s768_s21, 256 }
  0x34   : > { %p770_p3 = scmp.lt.s32.totalorder %s196_s7, %s768_s21  ;;  %p771_p2 = scmp.lt.s32.totalorder %s769_s13, %s762_s14 }
  0x35   : > { %p766_p9 = pneg %p765_p6 }
  0x36   : > { %p772_p13 = por %p771_p2, %p770_p3 }
  0x38   : > { %p773_p12 = pnand %p772_p13, %p766_p9 }
  0x3a   : > { %776 = shalt.err (!%p773_p12)
}
  0x3b   : > { %612 = dma.hbm_to_vmem [thread:$0]  (!%p1146_p10), %s193_s15, 128, %s196_s7, %s185_s27  }
  0x3c   : > { %p1166_p8 = pnand %p572_p0, %p220_p1  ;;  %s202_s6 = sand.u32 1, %s921_s20  }
  0x3d   : > { %s571_s18 = sshll.u32 %s945_s26, 7  ;;  %s570_s5 = sshll.u32 %s202_s6, 5 }
  0x3e   : > { %s211_s21 = scalar_lea.hbm %s1296_s1, %s571_s18  ;;  %s206_s17 = scalar_lea.vmem [#allocation7], %s570_s5 }
  0x3f   : > { %s212_s13 = sshll.u32 %s206_s17, 4  ;;  %s203_s0 = scalar_lea.sflag [#allocation8], %s202_s6  ;;  %s213_s13 = int_to_ptr.vmem [resolvable:$true] %s212_s13 }
  0x40   : > { %p779_p13 = pneg %p1152_p11  ;;  %s790_s15 = scalar_lea.vmem %s213_s13, 512 }
  0x41   : > { %p791_p2 = scmp.ne.s32.totalorder %s213_s13, %s790_s15  ;;  %s956_s27 = smov [#allocation7]  }
  0x42   : > { %s795_s7 = sshll.u32 %s956_s27, 4  ;;  %s796_s7 = int_to_ptr.vmem [resolvable:$false] %s795_s7 }
  0x43   : > { %p793_p9 = pnand %p791_p2, %p779_p13  ;;  %s797_s23 = scalar_lea.vmem %s796_s7, 1024 }
  0x44   : > { %p798_p0 = scmp.lt.s32.totalorder %s213_s13, %s796_s7  ;;  %p799_p1 = scmp.lt.s32.totalorder %s797_s23, %s790_s15 }
  0x45   : > { %p794_p10 = pneg %p793_p9 }
  0x46   : > { %p800_p4 = por %p799_p1, %p798_p0 }
  0x48   : > { %p801_p5 = pnand %p800_p4, %p794_p10 }
  0x4a   : > { %804 = shalt.err (!%p801_p5)
}
  0x4b   : > { %s957_s18 = smov 256   ;;  %s958_s5 = smov 128  }
  0x4c   : > { %s959_s14 = smov 8   ;;  %224 = sbr.rel (%p1166_p8) target bundleno = 775 (0x307), region = 32 }
  0x4d   : > { %615 = dma.hbm_to_vmem [thread:$0]  (!%p1152_p11), %s211_s21, 512, %s213_s13, %s203_s0, %s957_s18, %s958_s5, %s959_s14  }
  0x4e   : > { %s226_s6 = sand.u32 (!%p1166_p8), 1, %s929_s22  }
  0x4f   : > { %s1182_s8 = sshll.u32 (!%p1166_p8), %s226_s6, 3  ;;  %s227_s17 = scalar_lea.sflag (!%p1166_p8), [#allocation5], %s226_s6 }
  0x50   : > { %s230_s23 = scalar_lea.vmem (!%p1166_p8), [#allocation4], %s1182_s8 }
  0x51   : > { %888 = dma.done.wait (%p1090_p7), %s227_s17, 128  }
  0x52   : > { %890 = vsyncadd (%p1090_p7), %s227_s17, 4294967168  ;;  %s235_s9 = sand.u32 1, %s917_s19   ;;  %p1332_p11 = scmp.ne.s32.totalorder %s1322_s29, 0 }
  0x53   : > { %s574_s0 = sshll.u32 %s235_s9, 5  ;;  %s236_s21 = scalar_lea.sflag [#allocation8], %s235_s9 }
  0x54   : > { %s239_s30 = scalar_lea.vmem [#allocation7], %s574_s0 }
  0x55   : > { %892 = dma.done.wait (%p1332_p11), %s236_s21, 512  }
  0x56   : > { %894 = vsyncadd (%p1332_p11), %s236_s21, 4294966784  ;;  %s264_s13 = sand.u32 1, %s905_s16   ;;  %p273_p6 = scmp.lt.s32.totalorder %s941_s25, 2 }
  0x57   : > { %s1198_s12 = sshll.u32 %s264_s13, 3  ;;  %p577_p7 = scmp.ne.s32.totalorder %s937_s24, 0 }
  0x58   : > { %s274_s15 = scalar_select %p273_p6, %s941_s25, 2 }
  0x59   : > { %s266_s14 = scalar_lea.vmem [#allocation9], %s1198_s12  ;;  %280 = sbr.rel (%p577_p7) target bundleno = 96 (0x60), region = 44 }
  0x5a   : > { %s576_s27 = sshll.u32 %s274_s15, 3 }
  0x5b   : > { %s1204_s5 = scalar_lea.vmem %s1299_s4, %s576_s27 }
  0x5e   : > { %vm281_vm0 = vcmask 7168   ;;  %v960_v0 = vmov -inf   ;;  %v961_v1 = vmov 0.0  }
  0x5f   : > { %282 = vst.msk [vmem:[#allocation2] sm:$0xff] %vm281_vm0, %v960_v0  ;;  %283 = vst.msk [vmem:[#allocation3] sm:$0xff] %vm281_vm0, %v961_v1 }
  0x60 PF: > { %v288_v2 = vld [vmem:[%s239_s30 + $0x18] sm:$0xff]  ;;  %v962_v3 = vmov 0.0   ;;  %v287_v4 = vld [vmem:[%s239_s30 + $0x10] sm:$0xff]  ;;  %vm963_vm1 = vmmov 0   ;;  %v286_v5 = vld [vmem:[%s239_s30 + $0x8] sm:$0xff]  ;;  %vm295_vm2 = vcmask 261120   ;;  %v370_v8 = vlaneseq  ;;  %s289_s9 = scalar_lea.vmem %s1297_s2, %s937_s24 }
  0x61   : > { %592 = vmatprep.subr.mxu0 %v962_v3  ;;  %600 = vmatprep.mubr.msk.f32.mxu0 %vm963_vm1, %v962_v3  ;;  %v285_v6 = vld [vmem:[%s239_s30] sm:$0xff]  ;;  %v284_v7 = vld [vmem:[%s230_s23] sm:$0xff]  ;;  %s580_s29 = sshll.u32 %s937_s24, 7  ;;  %v964_v17 = vmov 0   ;;  %vm397_vm4 = vcmask 7168   ;;  %p581_p3 = scmp.ne.s32.totalorder %s937_s24, 1 }
  0x62   : > { %593 = vmatpush3.msra.mxu0 %v288_v2  ;;  %v371_v9 = vand.u32 127, %v370_v8  ;;  %v372_v10 = vstv %s580_s29  ;;  %v578_v12 = vld [vmem:[%s289_s9] ss:$0 sm:$0xff]  ;;  %742 = vset.pattern.permute.xlu0 %v964_v17 }
  0x63   : > { %594 = vmatprep.subr.mxu0 %v962_v3 }
  0x64   : > { %595 = vmatpush3.msra.mxu0 %v287_v4  ;;  %v373_v11 = vadd.s32 %v372_v10, %v371_v9 }
  0x65   : > { %596 = vmatprep.subr.mxu0 %v962_v3 }
  0x66   : > { %597 = vmatpush3.msra.mxu0 %v286_v5  ;;  %vm374_vm3 = vcmp.lt.s32.totalorder %v373_v11, 250  ;;  %v377_v18 = vld [vmem:[#allocation2] sm:$0xff]  ;;  %v381_v28 = vld [vmem:[#allocation3] sm:$0xff] }
  0x67   : > { %598 = vmatprep.subr.mxu0 %v962_v3 }
  0x68   : > { %599 = vmatpush3.msra.mxu0 %v285_v6 }
  0x69   : > { %601 = vmatmul.mubr.msk.f32.vlgmr.msra.gmra.mxu0 %vm295_vm2, %v284_v7 }
 0x129   : > { %v365_v13 = vpop.f32.mrf.mxu0 }
 0x12a   : > { %v366_v14 = vadd.f32 %v578_v12, %v365_v13 }
 0x12b   : > { %v602_v15 = vpop.f32.mrf.mxu0 }
 0x12c   : > { %v375_v16 = vsel %vm374_vm3, %v366_v14, -1e+30 }
 0x12d   : > { %378 = vmax.xlane.f32.xlu0 %v375_v16  ;;  %376 = vst [vmem:[%s266_s14] sm:$0xff] %v375_v16 }
 0x1b6   : > { %v379_v19 = vpop.xlane.xlu0 %378 }
 0x1b7   : > { %v380_v20 = vmax.f32 %v377_v18, %v379_v19 }
 0x1b9   : > { %v382_v21 = vsub.f32 %v377_v18, %v380_v20  ;;  %399 = vst.msk [vmem:[#allocation2] sm:$0xff] %vm397_vm4, %v380_v20  ;;  %388 = vperm.xlu0 %742, %v380_v20  }
 0x1bb   : > { %v383_v26 = vmul.f32 1.442695, %v382_v21 }
 0x234   : > { %v389_v22 = vpop.permute.xlu0 %388 }
 0x235   : > { %v391_v23 = vsub.f32 %v375_v16, %v389_v22 }
 0x237   : > { %v392_v24 = vmul.f32 1.442695, %v391_v23 }
 0x239   : > { %743 = vpow2.f32 %v392_v24 }
 0x23a   : > { %745 = vpow2.f32 %v383_v26 }
 0x246   : > { %v744_v25 = vpop.eup %743 }
 0x247   : > { %394 = vadd.xlane.f32.xlu1 %v744_v25  ;;  %v746_v27 = vpop.eup %745 }
 0x248   : > { %v385_v29 = vmul.f32 %v746_v27, %v381_v28 }
 0x2cf   : > { %403 = sbr.rel (%p581_p3) target bundleno = 750 (0x2ee), region = 48 }
 0x2d0   : > { %v395_v30 = vpop.xlane.xlu1 %394 }
 0x2d1   : > { %v396_v31 = vadd.f32 %v395_v30, %v385_v29 }
 0x2d3   : > { %398 = vst.msk [vmem:[#allocation3] sm:$0xff] %vm397_vm4, %v396_v31 }
 0x2d4   : > { %v404_v34 = vld [vmem:[#allocation2] sm:$0xff] }
 0x2da   : > { %v405_v32 = vld [vmem:[#allocation3] sm:$0xff] }
 0x2db   : > { %747 = vlog2.f32 %v405_v32 }
 0x2e8   : > { %v748_v33 = vpop.eup %747 }
 0x2e9   : > { %v407_v35 = vmul.f32 0.6931472, %v748_v33 }
 0x2eb   : > { %v408_v36 = vadd.f32 %v407_v35, %v404_v34 }
 0x2ed   : > { %409 = vst.msk [vmem:[%s1204_s5] sm:$0xff] %vm397_vm4, %v408_v36 }
 0x2ee PF: > { %s583_s8 = sshll.u32 %s941_s25, 1  ;;  %s430_s0 = sshll.u32 %s266_s14, 4  ;;  %s431_s0 = int_to_ptr.vmem [resolvable:$true] %s430_s0 }
 0x2ef   : > { %s426_s23 = sadd.s32 %s937_s24, %s583_s8  ;;  %s411_s7 = scalar_lea.sflag [#allocation6], %s264_s13 }
 0x2f0   : > { %s584_s21 = sshll.u32 %s426_s23, 7  ;;  %s805_s18 = scalar_lea.vmem %s431_s0, 128 }
 0x2f1   : > { %s428_s27 = scalar_lea.hbm %s1298_s3, %s584_s21  ;;  %p806_p12 = scmp.ne.s32.totalorder %s431_s0, %s805_s18 }
 0x2f2   : > { %p1333_p8 = scmp.ne.s32.totalorder %s1325_s11, 0  ;;  %s965_s5 = smov [#allocation9]  }
 0x2f3   : > { %s809_s29 = sshll.u32 %s965_s5, 4  ;;  %s810_s29 = int_to_ptr.vmem [resolvable:$false] %s809_s29 }
 0x2f4   : > { %p807_p13 = pnand %p806_p12, %p1333_p8  ;;  %s811_s25 = scalar_lea.vmem %s810_s29, 256 }
 0x2f5   : > { %p812_p9 = scmp.lt.s32.totalorder %s431_s0, %s810_s29  ;;  %p813_p10 = scmp.lt.s32.totalorder %s811_s25, %s805_s18 }
 0x2f6   : > { %p808_p2 = pneg %p807_p13 }
 0x2f7   : > { %p814_p0 = por %p813_p10, %p812_p9 }
 0x2f9   : > { %p815_p1 = pnand %p814_p0, %p808_p2 }
 0x2fb   : > { %818 = shalt.err (!%p815_p1)
}
 0x2fc   : > { %s819_s24 = scalar_lea.hbm %s428_s27, 128  ;;  %s823_s14 = scalar_lea.hbm %s1298_s3, 768 }
 0x2fd   : > { %p820_p4 = scmp.ne.s32.totalorder %s428_s27, %s819_s24  ;;  %p824_p6 = scmp.lt.s32.totalorder %s428_s27, %s1298_s3 }
 0x2fe   : > { %p825_p7 = scmp.lt.s32.totalorder %s823_s14, %s819_s24 }
 0x2ff   : > { %p821_p5 = pnand %p820_p4, %p1333_p8 }
 0x300   : > { %p826_p3 = por %p825_p7, %p824_p6 }
 0x301   : > { %p822_p11 = pneg %p821_p5 }
 0x303   : > { %p827_p12 = pnand %p826_p3, %p822_p11 }
 0x305   : > { %830 = shalt.err (!%p827_p12)
}
 0x306   : > { %607 = dma.vmem_to_hbm [thread:$0]  (%p1333_p8), %s431_s0, 128, %s428_s27, %s411_s7  }
 0x307 PF: > { %s1334_s9 = sld [smem:[#allocation13_spill]]  ;;  %p621_p13 = scmp.ge.s32.totalorder %s953_s28, 2 }
 0x308   : > { %p1335_p2 = scmp.ne.s32.totalorder %s1327_s10, 0 }
 0x30a   : > { %p617_p9 = pnand %p621_p13, %p1335_p2 }
 0x30c   : > { %p618_p10 = pneg %p617_p9 }
 0x30d   : > { %s445_s8 = sand.u32 1, %s1334_s9  }
 0x30e   : > { %s446_s23 = scalar_lea.sflag [#allocation6], %s445_s8 }
 0x30f   : > { %896 = dma.done.wait (%p618_p10), %s446_s23, 128  }
 0x310   : > { %898 = vsyncadd (%p618_p10), %s446_s23, 4294967168  ;;  %s24_s28 = sadd.s32 1, %s953_s28   ;;  %s1337_s11 = sld [smem:[#allocation14_spill]] }
 0x311   : > { %p1248_p0 = scmp.ge.s32.totalorder %s24_s28, 8   ;;  %s1338_s17 = sld [smem:[#allocation21_spill]] }
 0x312   : > { %s1339_s0 = sld [smem:[#allocation19_spill]]  ;;  %s1346_s15 = smov %s905_s16 }
 0x313   : > { %s1340_s30 = sld [smem:[#allocation15_spill]]  ;;  %s1348_s18 = smov %s917_s19 }
 0x314   : > { %s1341_s23 = sld [smem:[#allocation20_spill]]  ;;  %s1349_s19 = smov %s921_s20 }
 0x315   : > { %s1342_s25 = sld [smem:[#allocation16_spill]]  ;;  %s1351_s21 = smov %s929_s22 }
 0x316   : > { %s1343_s10 = sld [smem:[#allocation17_spill]]  ;;  %s1347_s16 = smov %s1337_s11 }
 0x317   : > { %s1344_s27 = sld [smem:[#allocation18_spill]]  ;;  %s1353_s24 = smov %s945_s26 }
 0x318   : > { %s1350_s20 = smov %s1339_s0  ;;  %23 = sbr.rel (!%p1248_p0) target bundleno = 14 (0xe), region = 111 }
 0x319   : > { %s1352_s22 = smov %s1340_s30 }
 0x31c   : > { %s1354_s26 = smov %s1343_s10 }
 0x31d   :  { %458 = vsyncpa [#allocation5], 1 }
 0x31e   :  { %460 = vsyncpa [#allocation5 + $0x1], 1 }
 0x31f   :  { %461 = vsyncpa [#allocation8], 1 }
 0x320   :  { %463 = vsyncpa [#allocation8 + $0x1], 1 }
 0x321   :  { %464 = vsyncpa [#allocation6], 1 }
 0x322   :  { %466 = vsyncpa [#allocation6 + $0x1], 1 }

</bundles_post_ra>
